<compile_context>
chip_gen: v6e
topology: v6e:2x2x1
jax: 0.10.0
libtpu: 0.0.40
codegen_flags: <defaults>
</compile_context>

<pallas_src>
import jax
import jax.numpy as jnp
from jax.experimental import pallas as pl
from jax.experimental.pallas import tpu as pltpu


def _conv_mm_kernel(w_ref, p_ref, b_ref, o_ref):
    # w_ref: (F, CKKp)    reshaped + zero-padded conv weights (resident)
    # p_ref: (CKKp, LT)   im2col patch lane tile of one batch image
    # b_ref: (F, 1)       bias (f32, resident)
    # o_ref: (F, LT)      lane-dense output tile -> unmasked vector stores
    acc = jnp.dot(w_ref[...], p_ref[...], preferred_element_type=jnp.float32)
    acc = acc + b_ref[...]                      # (F, 1) broadcasts across LT lanes
    o_ref[...] = acc.astype(o_ref.dtype)


def _im2col(x_pad, k, stride):
    """(N, C, Hp, Wp) -> ((N, C*k*k, Ho*Wo), Ho, Wo).

    Contraction ordering (c, kh, kw), c-major, matches weight.reshape(F, C*k*k).
    Batch stays the leading axis so no output transpose is needed afterwards.
    """
    N, C, Hp, Wp = x_pad.shape
    Ho = (Hp - k) // stride + 1
    Wo = (Wp - k) // stride + 1
    taps = []
    for kh in range(k):
        for kw in range(k):
            taps.append(
                jax.lax.slice(
                    x_pad,
                    (0, 0, kh, kw),
                    (N, C, kh + stride * (Ho - 1) + 1, kw + stride * (Wo - 1) + 1),
                    (1, 1, stride, stride),
                )  # (N, C, Ho, Wo)
            )
    patches = jnp.stack(taps, axis=2)            # (N, C, k*k, Ho, Wo)
    return patches.reshape(N, C * k * k, Ho * Wo), Ho, Wo


def _pick_lane_tile(l_spatial, n_batch, ckk_pad, f, in_bytes, out_bytes,
                    vmem_budget_bytes=16 * 1024 * 1024):
    """Largest 128-multiple lane tile whose double-buffered streams fit the budget."""
    max_tile = 16384 if in_bytes <= 2 else 8192
    per_lane = 2 * (ckk_pad * in_bytes + f * out_bytes)   # 2-deep P-in + O-out
    lt = (vmem_budget_bytes // per_lane) // 128 * 128
    lt = int(max(128, min(lt, max_tile)))
    lt = min(lt, pl.cdiv(l_spatial, 128) * 128)           # no need past one image
    # Keep >= 2 grid steps so "parallel" can feed both v7x TensorCores.
    if n_batch * pl.cdiv(l_spatial, lt) < 2 and lt > 128:
        lt = max(128, (lt // 2) // 128 * 128)
    return lt


def analysis_forward(x, weight, bias, *, k, stride=1, p=0, compute_dtype=None):
    """Forward pass of Analysis: ReflectionPad2d(pad) -> Conv2d(k, stride, bias=True)."""
    pad = (k - 1) // 2 if not p else p
    # Reflection padding (matches torch.nn.ReflectionPad2d) -- layout glue in XLA.
    x_pad = jnp.pad(x, ((0, 0), (0, 0), (pad, pad), (pad, pad)), mode="reflect")

    # Cast BEFORE im2col so the materialized patch stream is already narrow.
    if compute_dtype is not None:
        x_pad = x_pad.astype(compute_dtype)

    N, C = x.shape[0], x.shape[1]
    F = weight.shape[0]
    CKK = C * k * k
    CKK_pad = pl.cdiv(CKK, 8) * 8          # zero-pad contraction dim to 8 sublanes

    patches, Ho, Wo = _im2col(x_pad, k, stride)            # (N, CKK, L)
    L = Ho * Wo

    in_bytes = jnp.dtype(compute_dtype) .itemsize if compute_dtype is not None \
        else jnp.dtype(x.dtype).itemsize
    out_bytes = jnp.dtype(x.dtype).itemsize

    LT = _pick_lane_tile(L, N, CKK_pad, F, in_bytes, out_bytes)
    n_tiles = pl.cdiv(L, LT)
    L_pad = n_tiles * LT

    patches = jnp.pad(patches, ((0, 0), (0, CKK_pad - CKK), (0, L_pad - L)))

    w2 = weight.reshape(F, CKK)
    if compute_dtype is not None:
        w2 = w2.astype(compute_dtype)
    w2 = jnp.pad(w2, ((0, 0), (0, CKK_pad - CKK)))
    b2 = bias.reshape(F, 1).astype(jnp.float32)

    grid = (N, n_tiles)
    out_flat = pl.pallas_call(
        _conv_mm_kernel,
        out_shape=jax.ShapeDtypeStruct((N, F, L_pad), x.dtype),
        grid_spec=pltpu.PrefetchScalarGridSpec(
            num_scalar_prefetch=0,
            grid=grid,
            in_specs=[
                pl.BlockSpec((F, CKK_pad), lambda n, j: (0, 0)),          # weights
                pl.BlockSpec((None, CKK_pad, LT), lambda n, j: (n, 0, j)),  # patches
                pl.BlockSpec((F, 1), lambda n, j: (0, 0)),                # bias
            ],
            out_specs=pl.BlockSpec((None, F, LT), lambda n, j: (n, 0, j)),
        ),
        compiler_params=pltpu.CompilerParams(
            dimension_semantics=("parallel", "parallel"),
            vmem_limit_bytes=32 * 1024 * 1024,
            # Let XLA fuse the im2col producer into the patches operand instead
            # of materializing the full (N, CKK, L) array in HBM.
            allow_input_fusion=[False, True, False],
        ),
        cost_estimate=pl.CostEstimate(
            flops=2 * N * F * CKK_pad * L_pad,
            transcendentals=0,
            bytes_accessed=(F * CKK_pad * in_bytes
                            + N * CKK_pad * L_pad * in_bytes
                            + N * F * L_pad * out_bytes
                            + F * 4),
        ),
    )(w2, patches, b2)

    # (N, F, L) -> (N, F, Ho, Wo): free reshape, no transpose.
    return out_flat[:, :, :L].reshape(N, F, Ho, Wo)


def _reference(x, weight, bias, *, k, stride=1, p=0):
    pad = (k - 1) // 2 if not p else p
    x_pad = jnp.pad(x, ((0, 0), (0, 0), (pad, pad), (pad, pad)), mode="reflect")
    out = jax.lax.conv_general_dilated(
        x_pad, weight, window_strides=(stride, stride), padding="VALID",
        dimension_numbers=("NCHW", "OIHW", "NCHW"),
    )
    return out + bias.reshape(1, -1, 1, 1)


if __name__ == "__main__":
    # Module config: Analysis(nChannels=4, nFeat=32, k=3, str=1, p=0)
    nChannels, nFeat, k, stride, p = 4, 32, 3, 1, 0
    N, H, W = 2, 16, 16

    key = jax.random.PRNGKey(0)
    kx, kw_key, kb = jax.random.split(key, 3)

    x = jax.random.normal(kx, (N, nChannels, H, W), dtype=jnp.float32)
    # Deterministic parameter init (shapes per nn.Conv2d(nChannels, nFeat, k)).
    fan_in = nChannels * k * k
    bound = 1.0 / (fan_in ** 0.5)
    weight = jax.random.uniform(kw_key, (nFeat, nChannels, k, k),
                                minval=-bound, maxval=bound, dtype=jnp.float32)
    bias = jax.random.uniform(kb, (nFeat,), minval=-bound, maxval=bound,
                              dtype=jnp.float32)

    ref = _reference(x, weight, bias, k=k, stride=stride, p=p)

    # f32 operands: tight tolerance.
    out = analysis_forward(x, weight, bias, k=k, stride=stride, p=p)
    out = jax.block_until_ready(out)
    assert out.shape == ref.shape == (N, nFeat, H, W)
    assert jnp.allclose(out, ref, atol=1e-4, rtol=1e-4)

    # bf16 operands (recommended default at production sizes): looser tolerance.
    out_bf16 = analysis_forward(x, weight, bias, k=k, stride=stride, p=p,
                                compute_dtype=jnp.bfloat16)
    out_bf16 = jax.block_until_ready(out_bf16)
    assert jnp.allclose(out_bf16, ref, atol=5e-2, rtol=5e-2)

    print("KERNEL_OK")
</pallas_src>

<mosaic_0001>
module attributes {stable_mosaic.version = 11 : i64} {
  func.func @_conv_mm_kernel(%arg0: i32, %arg1: i32, %arg2: memref<32x40xf32, #tpu.memory_space<vmem>>, %arg3: memref<1x40x256xf32, #tpu.memory_space<vmem>>, %arg4: memref<32x1xf32, #tpu.memory_space<vmem>>, %arg5: memref<1x32x256xf32, #tpu.memory_space<vmem>>) attributes {dimension_semantics = [#tpu.dimension_semantics<parallel>, #tpu.dimension_semantics<parallel>], iteration_bounds = array<i64: 2, 1>, scalar_prefetch = 0 : i64, scratch_operands = 0 : i64, tpu.core_type = #tpu.core_type<tc>, window_params = [{pipeline_mode = #tpu.pipeline_mode<synchronous>, transform_indices = @transform_0, window_bounds = array<i64: 32, 40>}, {transform_indices = @transform_1, window_bounds = array<i64: 1, 40, 256>}, {pipeline_mode = #tpu.pipeline_mode<synchronous>, transform_indices = @transform_2, window_bounds = array<i64: 32, 1>}, {transform_indices = @transform_3, window_bounds = array<i64: 1, 32, 256>}]} {
    %c0 = arith.constant 0 : index
    %c0_0 = arith.constant 0 : index
    %0 = vector.load %arg2[%c0, %c0_0] : memref<32x40xf32, #tpu.memory_space<vmem>>, vector<32x40xf32>
    %c0_1 = arith.constant 0 : index
    %c0_2 = arith.constant 0 : index
    %c0_3 = arith.constant 0 : index
    %1 = vector.load %arg3[%c0_1, %c0_2, %c0_3] : memref<1x40x256xf32, #tpu.memory_space<vmem>>, vector<1x40x256xf32>
    %2 = vector.shape_cast %1 : vector<1x40x256xf32> to vector<40x256xf32>
    %cst = arith.constant dense<0.000000e+00> : vector<32x256xf32>
    %3 = tpu.matmul %0, %2, %cst {dimension_numbers = #tpu.dot_dimension_numbers<[1], [0], [0], [1], [0, 0, 1, 1], [], []>} : vector<32x40xf32>, vector<40x256xf32>, vector<32x256xf32> -> vector<32x256xf32>
    %c0_4 = arith.constant 0 : index
    %c0_5 = arith.constant 0 : index
    %4 = vector.load %arg4[%c0_4, %c0_5] : memref<32x1xf32, #tpu.memory_space<vmem>>, vector<32x1xf32>
    %5 = vector.broadcast %4 : vector<32x1xf32> to vector<32x256xf32>
    %6 = arith.addf %3, %5 : vector<32x256xf32>
    %c0_6 = arith.constant 0 : index
    %c0_7 = arith.constant 0 : index
    %c0_8 = arith.constant 0 : index
    %7 = vector.load %arg5[%c0_6, %c0_7, %c0_8] : memref<1x32x256xf32, #tpu.memory_space<vmem>>, vector<1x32x256xf32>
    %8 = vector.shape_cast %7 : vector<1x32x256xf32> to vector<32x256xf32>
    %9 = vector.shape_cast %6 : vector<32x256xf32> to vector<1x32x256xf32>
    tpu.vector_store %arg5[%c0_6, %c0_7, %c0_8], %9 {strides = array<i32>} : memref<1x32x256xf32, #tpu.memory_space<vmem>>, vector<1x32x256xf32>,
    return
  }
  func.func @transform_0(%arg0: i32, %arg1: i32) -> (i32, i32) {
    %c0_i32 = arith.constant 0 : i32
    %c0_i32_0 = arith.constant 0 : i32
    %c0_i32_1 = arith.constant 0 : i32
    return %c0_i32, %c0_i32_0 : i32, i32
  }
  func.func @transform_1(%arg0: i32, %arg1: i32) -> (i32, i32, i32) {
    %c0_i32 = arith.constant 0 : i32
    %c0_i32_0 = arith.constant 0 : i32
    return %arg0, %c0_i32, %arg1 : i32, i32, i32
  }
  func.func @transform_2(%arg0: i32, %arg1: i32) -> (i32, i32) {
    %c0_i32 = arith.constant 0 : i32
    %c0_i32_0 = arith.constant 0 : i32
    %c0_i32_1 = arith.constant 0 : i32
    return %c0_i32, %c0_i32_0 : i32, i32
  }
  func.func @transform_3(%arg0: i32, %arg1: i32) -> (i32, i32, i32) {
    %c0_i32 = arith.constant 0 : i32
    %c0_i32_0 = arith.constant 0 : i32
    return %arg0, %c0_i32, %arg1 : i32, i32, i32
  }
}

</mosaic_0001>

<bundles_post_ra>
// kernel: tpu_custom_call.1
= control target key start
LH: loop header
LB: loop body
LE: loop exit
PB: predicated region body
PF: predicated region fallthrough
CT: control target
= control target key end

     0   :  { %8 = vsyncpa [#allocation3], 0  ;;  %s885_s0 = inlined_call_operand.vmem [shape: f32[32,40], index: 0, kind: input, shape index: {}]   ;;  %s886_s1 = inlined_call_operand.hbm [shape: f32[2,40,256], index: 1, kind: input, shape index: {}]   ;;  %s887_s2 = inlined_call_operand.vmem [shape: f32[32,1], index: 2, kind: input, shape index: {}]   ;;  %s888_s3 = inlined_call_operand.hbm [shape: f32[2,32,256], index: 3, kind: output, shape index: {}]  }
   0x1   :  { %10 = vsyncpa [#allocation3 + $0x1], 0 }
   0x2   :  { %11 = vsyncpa [#allocation4], 0 }
   0x3   :  { %13 = vsyncpa [#allocation4 + $0x1], 0  ;;  %s698_s12 = smov 0   ;;  %s700_s13 = smov 0  }
   0x4   :  { %s702_s14 = smov 0   ;;  %s704_s15 = smov 0  }
   0x5   :  { %s706_s16 = smov 0   ;;  %s708_s17 = smov 0  }
   0x6 LB: > { %s460_s18 = sadd.s32 4294967295, %s668_s17   ;;  %s461_s19 = sadd.s32 4294967294, %s668_s17   ;;  %s668_s17 = sphi %s708_s17, %s19_s17   ;;  %s664_s16 = sphi %s706_s16, %s899_s16   ;;  %s660_s15 = sphi %s704_s15, %s898_s15   ;;  %s656_s14 = sphi %s702_s14, %s897_s14   ;;  %s652_s13 = sphi %s700_s13, %s896_s13   ;;  %s648_s12 = sphi %s698_s12, %s895_s12  }
   0x7   : > { %s31_s20 = sadd.s32 1, %s664_s16  ;;  %s61_s21 = sadd.s32 1, %s656_s14 }
   0x8   : > { %p33_p0 = scmp.ge.s32.totalorder %s31_s20, 2  ;;  %p68_p1 = scmp.ne.s32.totalorder %s656_s14, %s652_s13 }
   0x9   : > { %p69_p2 = scmp.eq.s32.totalorder %s668_s17, 0  ;;  %p74_p3 = scmp.ne.s32.totalorder %s652_s13, %s648_s12 }
   0xa   : > { %s901_s20 = smov (%p33_p0, %s31_s20), 0  ;;  %p75_p5 = scmp.eq.s32.totalorder %s460_s18, 0 }
   0xb   : > { %p739_p4 = por %p69_p2, %p68_p1  ;;  %s56_s23 = ssub.s32 %s664_s16, %s901_s20 }
   0xc   : > { %p121_p6 = scmp.eq.s32.totalorder %s460_s18, 1  ;;  %p59_p7 = scmp.eq.s32.totalorder %s56_s23, 0 }
   0xd   : > { %p745_p8 = por %p75_p5, %p74_p3  ;;  %p127_p10 = scmp.eq.s32.totalorder %s461_s19, 1 }
   0xe   : > { %p749_p9 = por %p121_p6, %p68_p1  ;;  %p502_p13 = scmp.lt.s32.totalorder %s668_s17, 2 }
   0xf   : > { %s754_s26 = scalar_select %p59_p7, %s656_s14, %s61_s21  }
  0x10   : > { %p756_p11 = por %p127_p10, %p74_p3  ;;  %s153_s28 = sand.u32 1, %s656_s14  }
  0x11   : > { %s487_s29 = smul.u32 80, %s153_s28  ;;  %p766_p0 = pnand %p502_p13, %p739_p4 }
  0x12   : > { %s488_s30 = smul.u32 1280, %s664_s16  ;;  %p465_p1 = scmp.ge.s32.totalorder %s668_s17, 1 }
  0x13   : > { %s157_s8 = scalar_lea.vmem [#allocation2], %s487_s29  ;;  %s154_s10 = scalar_lea.sflag [#allocation3], %s153_s28 }
  0x14   : > { %s165_s7 = scalar_lea.hbm %s886_s1, %s488_s30  ;;  %s166_s9 = sshll.u32 %s157_s8, 4  ;;  %s167_s9 = int_to_ptr.vmem [resolvable:$true] %s166_s9 }
  0x15   : > { %p562_p2 = pneg %p766_p0  ;;  %s573_s11 = scalar_lea.vmem %s167_s9, 1280 }
  0x16   : > { %p574_p3 = scmp.ne.s32.totalorder %s167_s9, %s573_s11  ;;  %s670_s18 = smov [#allocation2]  }
  0x17   : > { %s578_s19 = sshll.u32 %s670_s18, 4  ;;  %s579_s19 = int_to_ptr.vmem [resolvable:$false] %s578_s19 }
  0x18   : > { %p576_p5 = pnand %p574_p3, %p562_p2  ;;  %s580_s21 = scalar_lea.vmem %s579_s19, 2560 }
  0x19   : > { %p581_p4 = scmp.lt.s32.totalorder %s167_s9, %s579_s19  ;;  %p582_p7 = scmp.lt.s32.totalorder %s580_s21, %s573_s11 }
  0x1a   : > { %p577_p6 = pneg %p576_p5 }
  0x1b   : > { %p583_p10 = por %p582_p7, %p581_p4 }
  0x1d   : > { %p584_p13 = pnand %p583_p10, %p577_p6 }
  0x1f   : > { %587 = shalt.err (!%p584_p13)
}
  0x20   : > { %s671_s22 = smov 256   ;;  %s672_s23 = smov 16  }
  0x21   : > { %497 = dma.hbm_to_vmem [thread:$0]  (!%p766_p0), %s165_s7, 1280, %s167_s9, %s154_s10, %s671_s22, %s671_s22, %s672_s23  }
  0x22   : > { %p174_p12 = scmp.lt.s32.totalorder %s668_s17, 3 }
  0x24   : > { %p175_p2 = pnand %p465_p1, %p174_p12 }
  0x25   : > { %s782_s28 = sand.u32 (!%p175_p2), 1, %s652_s13  }
  0x26   : > { %178 = sbr.rel (%p175_p2) target bundleno = 272 (0x110), region = 32  ;;  %s181_s30 = scalar_lea.sflag (!%p175_p2), [#allocation3], %s782_s28 }
  0x27   : > { %s489_s29 = smul.u32 (!%p175_p2), 80, %s782_s28 }
  0x29   : > { %s786_s5 = scalar_lea.vmem (!%p175_p2), [#allocation2], %s489_s29 }
  0x2b   : > { %639 = dma.done.wait (%p745_p8), %s181_s30, 1280  }
  0x2c   : > { %641 = vsyncadd (%p745_p8), %s181_s30, 4294966016  ;;  %v673_v0 = vmov 0.0   ;;  %v674_v1 = vmov 0   ;;  %v222_v2 = vld [vmem:[%s786_s5 + $0x48] sm:$0xff]  ;;  %v221_v3 = vld [vmem:[%s786_s5 + $0x40] sm:$0xff]  ;;  %vm247_vm0 = vcmask 326656  }
  0x2d   : > { %324 = vmatprep.mubr.f32.mxu0 %v673_v0  ;;  %336 = vmatprep.mubr.f32.mxu1 %v673_v0  ;;  %v220_v4 = vld [vmem:[%s786_s5 + $0x38] sm:$0xff]  ;;  %v219_v5 = vld [vmem:[%s786_s5 + $0x30] sm:$0xff]  ;;  %v218_v6 = vld [vmem:[%s786_s5 + $0x28] sm:$0xff]  ;;  %s466_s24 = sshll.u32 %s782_s28, 6  ;;  %s476_s7 = sshll.u32 %s660_s15, 10 }
  0x2e   : > { %559 = vset.pattern.permute.xlu1 %v674_v1  ;;  %558 = vset.pattern.permute.xlu0 %v674_v1  ;;  %v217_v7 = vld [vmem:[%s786_s5 + $0x20] sm:$0xff]  ;;  %v216_v8 = vld [vmem:[%s786_s5 + $0x18] sm:$0xff]  ;;  %v215_v9 = vld [vmem:[%s786_s5 + $0x10] sm:$0xff]  ;;  %s206_s4 = scalar_lea.vmem [#allocation5], %s466_s24  ;;  %s837_s10 = scalar_lea.hbm %s888_s3, %s476_s7 }
  0x2f   : > { %282 = vmatprep.subr.mxu0 %v222_v2  ;;  %477 = vmatprep.subr.mxu1 %v222_v2  ;;  %v214_v10 = vld [vmem:[%s786_s5 + $0x8] sm:$0xff]  ;;  %v213_v11 = vld [vmem:[%s786_s5] sm:$0xff]  ;;  %s373_s6 = sshll.u32 %s206_s4, 4  ;;  %s358_s15 = scalar_lea.sflag [#allocation4], %s782_s28  ;;  %s832_s6 = int_to_ptr.vmem [resolvable:$true] %s373_s6 }
  0x30   : > { %283 = vmatpush1.msra.mxu0 %v221_v3  ;;  %482 = vmatpush1.msra.mxu1 %v221_v3  ;;  %v209_v12 = vld [vmem:[%s885_s0] sm:$0xff]  ;;  %v211_v13 = vld [vmem:[%s885_s0 + $0x10] sm:$0xff]  ;;  %v210_v16 = vld [vmem:[%s885_s0 + $0x8] sm:$0xff]  ;;  %s588_s11 = scalar_lea.vmem %s832_s6, 1024  ;;  %s675_s18 = smov [#allocation5]  }
  0x31   : > { %284 = vmatprep.subr.mxu0 %v220_v4  ;;  %478 = vmatprep.subr.mxu1 %v220_v4  ;;  %v225_v14 = vld [vmem:[%s887_s2 + $0x10] sm:$0xff]  ;;  %v223_v15 = vld [vmem:[%s887_s2] sm:$0xff]  ;;  %v212_v17 = vld [vmem:[%s885_s0 + $0x18] sm:$0xff]  ;;  %p589_p8 = scmp.ne.s32.totalorder %s832_s6, %s588_s11  ;;  %s592_s19 = sshll.u32 %s675_s18, 4  ;;  %s593_s19 = int_to_ptr.vmem [resolvable:$false] %s592_s19 }
  0x32   : > { %285 = vmatpush1.msra.mxu0 %v219_v5  ;;  %483 = vmatpush1.msra.mxu1 %v219_v5  ;;  %v226_v18 = vld [vmem:[%s887_s2 + $0x18] sm:$0xff]  ;;  %v224_v19 = vld [vmem:[%s887_s2 + $0x8] sm:$0xff]  ;;  %s594_s21 = scalar_lea.vmem %s593_s19, 2048  ;;  %p595_p1 = scmp.lt.s32.totalorder %s832_s6, %s593_s19 }
  0x33   : > { %286 = vmatprep.subr.mxu0 %v218_v6  ;;  %479 = vmatprep.subr.mxu1 %v218_v6  ;;  %p590_p12 = pnand %p589_p8, %p749_p9  ;;  %p596_p3 = scmp.lt.s32.totalorder %s594_s21, %s588_s11 }
  0x34   : > { %287 = vmatpush1.msra.mxu0 %v217_v7  ;;  %484 = vmatpush1.msra.mxu1 %v217_v7 }
  0x35   : > { %288 = vmatprep.subr.mxu0 %v216_v8  ;;  %480 = vmatprep.subr.mxu1 %v216_v8  ;;  %p591_p0 = pneg %p590_p12  ;;  %p597_p5 = por %p596_p3, %p595_p1 }
  0x36   : > { %289 = vmatpush1.msra.mxu0 %v215_v9  ;;  %485 = vmatpush1.msra.mxu1 %v215_v9 }
  0x37   : > { %290 = vmatprep.subr.mxu0 %v214_v10  ;;  %481 = vmatprep.subr.mxu1 %v214_v10  ;;  %p598_p6 = pnand %p597_p5, %p591_p0 }
  0x38   : > { %291 = vmatpush1.msra.mxu0 %v213_v11  ;;  %486 = vmatpush1.msra.mxu1 %v213_v11 }
  0x39   : > { %467 = vmatmul.mubr.msk.f32.vlgmr.msra.gmra.mxu0 %vm247_vm0, %v209_v12  ;;  %469 = vmatmul.mubr.msk.f32.vlgmr.msra.gmra.mxu1 %vm247_vm0, %v211_v13 }
  0x3a   : > { %330 = vmatprep.mubr.f32.mxu0 %v673_v0  ;;  %342 = vmatprep.mubr.f32.mxu1 %v673_v0 }
  0x3b   : > { %239 = vperm.xlu1 %559, %v225_v14   ;;  %229 = vperm.xlu0 %558, %v223_v15  }
  0x3d   : > { %468 = vmatmul.mubr.msk.f32.gmra.mxu0 %vm247_vm0, %v210_v16  ;;  %470 = vmatmul.mubr.msk.f32.gmra.mxu1 %vm247_vm0, %v212_v17 }
  0x3f   : > { %244 = vperm.xlu1 %559, %v226_v18   ;;  %234 = vperm.xlu0 %558, %v224_v19  }
  0xb6   : > { %v240_v20 = vpop.permute.xlu1 %239  ;;  %v230_v21 = vpop.permute.xlu0 %229 }
  0xba   : > { %v245_v28 = vpop.permute.xlu1 %244  ;;  %v235_v29 = vpop.permute.xlu0 %234 }
  0xf9   : > { %v326_v22 = vpop.f32.mrf.mxu0  ;;  %v338_v23 = vpop.f32.mrf.mxu1 }
  0xfa   : > { %v327_v24 = vadd.f32 %v326_v22, %v230_v21  ;;  %v339_v25 = vadd.f32 %v338_v23, %v240_v20 }
  0xfb   : > { %v328_v26 = vpop.f32.mrf.mxu0  ;;  %v340_v27 = vpop.f32.mrf.mxu1 }
  0xfc   : > { %349 = vst [vmem:[%s206_s4] sm:$0xff] %v327_v24  ;;  %353 = vst [vmem:[%s206_s4 + $0x20] sm:$0xff] %v339_v25  ;;  %v329_v30 = vadd.f32 %v328_v26, %v230_v21  ;;  %v341_v31 = vadd.f32 %v340_v27, %v240_v20 }
  0xfd   : > { %v332_v32 = vpop.f32.mrf.mxu0  ;;  %v344_v33 = vpop.f32.mrf.mxu1 }
  0xfe   : > { %350 = vst [vmem:[%s206_s4 + $0x8] sm:$0xff] %v329_v30  ;;  %354 = vst [vmem:[%s206_s4 + $0x28] sm:$0xff] %v341_v31  ;;  %v333_v34 = vadd.f32 %v332_v32, %v235_v29  ;;  %v345_v35 = vadd.f32 %v344_v33, %v245_v28 }
  0xff   : > { %v334_v36 = vpop.f32.mrf.mxu0  ;;  %v346_v37 = vpop.f32.mrf.mxu1 }
 0x100   : > { %351 = vst [vmem:[%s206_s4 + $0x10] sm:$0xff] %v333_v34  ;;  %355 = vst [vmem:[%s206_s4 + $0x30] sm:$0xff] %v345_v35  ;;  %v335_v38 = vadd.f32 %v334_v36, %v235_v29  ;;  %v347_v39 = vadd.f32 %v346_v37, %v245_v28 }
 0x102   : > { %352 = vst [vmem:[%s206_s4 + $0x18] sm:$0xff] %v335_v38  ;;  %356 = vst [vmem:[%s206_s4 + $0x38] sm:$0xff] %v347_v39 }
 0x103   : > { %601 = shalt.err (!%p598_p6)
}
 0x104   : > { %s602_s22 = scalar_lea.hbm %s837_s10, 1024  ;;  %s606_s30 = scalar_lea.hbm %s888_s3, 2048 }
 0x105   : > { %p603_p4 = scmp.ne.s32.totalorder %s837_s10, %s602_s22  ;;  %p607_p13 = scmp.lt.s32.totalorder %s837_s10, %s888_s3 }
 0x106   : > { %p608_p2 = scmp.lt.s32.totalorder %s606_s30, %s602_s22 }
 0x107   : > { %p604_p7 = pnand %p603_p4, %p749_p9 }
 0x108   : > { %p609_p8 = por %p608_p2, %p607_p13 }
 0x109   : > { %p605_p10 = pneg %p604_p7 }
 0x10b   : > { %p610_p12 = pnand %p609_p8, %p605_p10 }
 0x10d   : > { %613 = shalt.err (!%p610_p12)
}
 0x10e   : > { %s676_s4 = smov 256   ;;  %s677_s7 = smov 16  }
 0x10f   : > { %492 = dma.vmem_to_hbm [thread:$0]  (%p749_p9), %s832_s6, 1024, %s837_s10, %s358_s15, %s676_s4, %s676_s4, %s677_s7  }
 0x110 PF: > { %s388_s8 = sand.u32 1, %s648_s12   ;;  %p894_p0 = scmp.ge.s32.totalorder %s668_s17, 2 }
 0x111   : > { %s389_s9 = scalar_lea.sflag [#allocation4], %s388_s8 }
 0x112   : > { %p499_p1 = pnand %p894_p0, %p756_p11 }
 0x114   : > { %p500_p3 = pneg %p499_p1 }
 0x116   : > { %643 = dma.done.wait (%p500_p3), %s389_s9, 1024  }
 0x117   : > { %645 = vsyncadd (%p500_p3), %s389_s9, 4294966272  ;;  %s19_s17 = sadd.s32 1, %s668_s17   ;;  %s895_s12 = smov %s652_s13 }
 0x118   : > { %p16_p5 = scmp.ge.s32.totalorder %s19_s17, 4   ;;  %s896_s13 = smov %s656_s14 }
 0x119   : > { %s897_s14 = smov %s754_s26  ;;  %s898_s15 = smov %s664_s16 }
 0x11a   : > { %s899_s16 = smov %s901_s20  ;;  %18 = sbr.rel (!%p16_p5) target bundleno = 6 (0x6), region = 77 }
 0x11f   :  { %394 = vsyncpa [#allocation3], 1 }
 0x120   :  { %396 = vsyncpa [#allocation3 + $0x1], 1 }
 0x121   :  { %397 = vsyncpa [#allocation4], 1 }
 0x122   :  { %399 = vsyncpa [#allocation4 + $0x1], 1 }

</bundles_post_ra>
